<compile_context>
chip_gen: v7x
topology: tpu7x:2x2x1
jax: 0.10.0
libtpu: 0.0.40
codegen_flags: <defaults>
</compile_context>

<pallas_src>
import functools

import jax
import jax.numpy as jnp
from jax.experimental import pallas as pl
from jax.experimental.pallas import tpu as pltpu

CLS_LOSS_COEF = 1.0


def _round_up(x, m):
    return ((x + m - 1) // m) * m


def _make_kernel(n_valid, tile_n, needs_row_mask, inv_n, coef):
    def kernel(x_ref, tgt_ref, mask_ref, loss_ref, acc_ref):
        # x_ref   : (tile_n, C)  native dtype, VMEM (pipelined)
        # tgt_ref : (tile_n, 1)  int32, VMEM (pipelined)
        # mask_ref: (1, M)       f32, VMEM (resident: constant block index)
        # loss_ref: (1, 1)       f32 output
        # acc_ref : (1, 1)       f32 VMEM scratch (sum of target log-probs)
        @pl.when(pl.program_id(0) == 0)
        def _init():
            acc_ref[...] = jnp.zeros_like(acc_ref)

        x = x_ref[...].astype(jnp.float32)                      # (tile_n, C)
        row_max = jnp.max(x, axis=1, keepdims=True)             # (tile_n, 1)
        shifted = x - row_max                                   # (tile_n, C)
        lse = jnp.log(jnp.sum(jnp.exp(shifted), axis=1, keepdims=True))  # (tile_n, 1)

        tgt = tgt_ref[...]                                      # (tile_n, 1) int32
        cols = jax.lax.broadcasted_iota(jnp.int32, x.shape, 1)  # (tile_n, C)
        tsel = jnp.sum(jnp.where(cols == tgt, shifted, 0.0),
                       axis=1, keepdims=True)                   # (tile_n, 1)
        picked = tsel - lse                                     # log p[target] per row

        if needs_row_mask:
            rows = (jax.lax.broadcasted_iota(jnp.int32, picked.shape, 0)
                    + pl.program_id(0) * tile_n)
            picked = jnp.where(rows < n_valid, picked, 0.0)     # zero out padded rows

        acc_ref[...] += jnp.sum(picked, keepdims=True)          # (1, 1)

        @pl.when(pl.program_id(0) == pl.num_programs(0) - 1)
        def _finalize():
            m = mask_ref[...].astype(jnp.float32)               # (1, M)
            s = jnp.sum(m, keepdims=True)                       # (1, 1)
            nll = -acc_ref[...] * inv_n                         # (1, 1) mean NLL
            # (nll * s) / s == nll when s != 0; NaN when s == 0 (matches PyTorch expr).
            loss_ref[...] = (nll * s) / s * coef

    return kernel


def brc_loss(output, target, mask, *, tile_n=None):
    """output: (N, C) float; target: (N,) int; mask: any shape (flattened)."""
    N, C = output.shape
    tgt2d = target.astype(jnp.int32).reshape(N, 1)
    mask2d = mask.reshape(1, -1).astype(jnp.float32)
    M = mask2d.shape[1]

    itemsize = int(jnp.dtype(output.dtype).itemsize)

    if tile_n is None:
        # Keep the x tile <= ~4 MiB so 2x-buffered input + in-kernel temps stay
        # well under the v7x 64 MiB VMEM (and v5e's smaller scoped default).
        bytes_per_row = max(1, C * itemsize)
        max_rows = max(8, (4 * 1024 * 1024) // bytes_per_row)
        tile_n = min(2048, max_rows, _round_up(N, 8))
    tile_n = max(8, (int(tile_n) // 8) * 8)

    Np = _round_up(N, tile_n)
    if Np != N:
        output_p = jnp.pad(output, ((0, Np - N), (0, 0)))
        tgt_p = jnp.pad(tgt2d, ((0, Np - N), (0, 0)))
    else:
        output_p, tgt_p = output, tgt2d

    grid = (Np // tile_n,)
    kernel = _make_kernel(N, tile_n, Np != N, 1.0 / N, CLS_LOSS_COEF)

    cost = pl.CostEstimate(
        flops=6 * N * C,
        transcendentals=N * C + N,
        bytes_accessed=N * C * itemsize + N * 4 + M * 4 + 4,
    )

    out = pl.pallas_call(
        kernel,
        out_shape=jax.ShapeDtypeStruct((1, 1), jnp.float32),
        grid=grid,
        in_specs=[
            pl.BlockSpec((tile_n, C), lambda i: (i, 0)),   # row tile of logits
            pl.BlockSpec((tile_n, 1), lambda i: (i, 0)),   # matching targets
            pl.BlockSpec((1, M), lambda i: (0, 0)),        # full mask, resident
        ],
        out_specs=pl.BlockSpec((1, 1), lambda i: (0, 0)),
        scratch_shapes=[pltpu.VMEM((1, 1), jnp.float32)],
        compiler_params=pltpu.CompilerParams(
            dimension_semantics=("arbitrary",),            # accumulation axis
            vmem_limit_bytes=32 * 1024 * 1024,
        ),
        cost_estimate=cost,
    )(output_p, tgt_p, mask2d)
    return out[0, 0]


def brc_loss_ref(output, target, mask):
    # pure-JAX reference of the exact PyTorch forward
    logp = jax.nn.log_softmax(output.astype(jnp.float32), axis=1)
    nll = -jnp.mean(jnp.take_along_axis(logp, target[:, None].astype(jnp.int32), axis=1))
    m = mask.reshape(-1).astype(jnp.float32)
    return (jnp.sum(m * nll) / jnp.sum(m)) * CLS_LOSS_COEF


if __name__ == "__main__":
    key = jax.random.PRNGKey(0)
    k1, k2, k3 = jax.random.split(key, 3)

    # Test 1: single-tile case (batch=8, classes=32).
    N, C = 8, 32
    output = jax.random.normal(k1, (N, C), dtype=jnp.float32)
    target = jax.random.randint(k2, (N,), 0, C, dtype=jnp.int32)
    mask = (jax.random.uniform(k3, (N,)) > 0.3).astype(jnp.float32)
    mask = mask.at[0].set(1.0)  # avoid all-zero mask (NaN, same as PyTorch)

    loss = brc_loss(output, target, mask)
    jax.block_until_ready(loss)
    ref = brc_loss_ref(output, target, mask)
    assert jnp.allclose(loss, ref, atol=1e-5, rtol=1e-5), (loss, ref)

    # Test 2: exercise the accumulating grid + row padding (N=20, tile_n=8 -> grid=3).
    k4, k5, k6 = jax.random.split(jax.random.PRNGKey(1), 3)
    N2, C2 = 20, 32
    output2 = jax.random.normal(k4, (N2, C2), dtype=jnp.float32)
    target2 = jax.random.randint(k5, (N2,), 0, C2, dtype=jnp.int32)
    mask2 = (jax.random.uniform(k6, (N2,)) > 0.3).astype(jnp.float32)
    mask2 = mask2.at[0].set(1.0)

    loss2 = brc_loss(output2, target2, mask2, tile_n=8)
    jax.block_until_ready(loss2)
    ref2 = brc_loss_ref(output2, target2, mask2)
    assert jnp.allclose(loss2, ref2, atol=1e-5, rtol=1e-5), (loss2, ref2)

    print("KERNEL_OK")
</pallas_src>

<mosaic_0001>
module attributes {stable_mosaic.version = 11 : i64} {
  func.func @kernel(%arg0: i32, %arg1: memref<8x32xf32, #tpu.memory_space<vmem>>, %arg2: memref<8x1xi32, #tpu.memory_space<vmem>>, %arg3: memref<1x8xf32, #tpu.memory_space<vmem>>, %arg4: memref<1x1xf32, #tpu.memory_space<vmem>>, %arg5: memref<1x1xf32, #tpu.memory_space<vmem>>) attributes {dimension_semantics = [#tpu.dimension_semantics<arbitrary>], iteration_bounds = array<i64: 1>, scalar_prefetch = 0 : i64, scratch_operands = 1 : i64, tpu.core_type = #tpu.core_type<tc>, window_params = [{transform_indices = @transform_0, window_bounds = array<i64: 8, 32>}, {transform_indices = @transform_1, window_bounds = array<i64: 8, 1>}, {pipeline_mode = #tpu.pipeline_mode<synchronous>, transform_indices = @transform_2, window_bounds = array<i64: 1, 8>}, {pipeline_mode = #tpu.pipeline_mode<synchronous>, transform_indices = @transform_3, window_bounds = array<i64: 1, 1>}]} {
    %c0_i32 = arith.constant 0 : i32
    %0 = arith.cmpi eq, %arg0, %c0_i32 : i32
    %1 = arith.extui %0 : i1 to i32
    %c0_i32_0 = arith.constant 0 : i32
    %2 = arith.cmpi ne, %1, %c0_i32_0 : i32
    scf.if %2 {
      %cst_14 = arith.constant 0.000000e+00 : f32
      %32 = vector.broadcast %cst_14 : f32 to vector<1x1xf32>
      %c0_15 = arith.constant 0 : index
      %c0_16 = arith.constant 0 : index
      %33 = vector.load %arg5[%c0_15, %c0_16] : memref<1x1xf32, #tpu.memory_space<vmem>>, vector<1x1xf32>
      tpu.vector_store %arg5[%c0_15, %c0_16], %32 {strides = array<i32>} : memref<1x1xf32, #tpu.memory_space<vmem>>, vector<1x1xf32>,
    } else {
    }
    %c0 = arith.constant 0 : index
    %c0_1 = arith.constant 0 : index
    %3 = vector.load %arg1[%c0, %c0_1] : memref<8x32xf32, #tpu.memory_space<vmem>>, vector<8x32xf32>
    %cst = arith.constant dense<0xFF800000> : vector<8xf32>
    %4 = vector.multi_reduction <maximumf>, %3, %cst [1] : vector<8x32xf32> to vector<8xf32>
    %5 = vector.shape_cast %4 : vector<8xf32> to vector<8x1xf32>
    %6 = vector.broadcast %5 : vector<8x1xf32> to vector<8x32xf32>
    %7 = arith.subf %3, %6 : vector<8x32xf32>
    %8 = math.exp %7 : vector<8x32xf32>
    %cst_2 = arith.constant dense<0.000000e+00> : vector<8xf32>
    %9 = vector.multi_reduction <add>, %8, %cst_2 [1] : vector<8x32xf32> to vector<8xf32>
    %10 = vector.shape_cast %9 : vector<8xf32> to vector<8x1xf32>
    %11 = math.log %10 : vector<8x1xf32>
    %c0_3 = arith.constant 0 : index
    %c0_4 = arith.constant 0 : index
    %12 = vector.load %arg2[%c0_3, %c0_4] : memref<8x1xi32, #tpu.memory_space<vmem>>, vector<8x1xi32>
    %13 = tpu.iota {dimensions = array<i32: 1>} : vector<8x32xi32>
    %14 = vector.broadcast %12 : vector<8x1xi32> to vector<8x32xi32>
    %15 = arith.cmpi eq, %13, %14 : vector<8x32xi32>
    %cst_5 = arith.constant 0.000000e+00 : f32
    %16 = vector.broadcast %cst_5 : f32 to vector<8x32xf32>
    %17 = arith.select %15, %7, %16 : vector<8x32xi1>, vector<8x32xf32>
    %cst_6 = arith.constant dense<0.000000e+00> : vector<8xf32>
    %18 = vector.multi_reduction <add>, %17, %cst_6 [1] : vector<8x32xf32> to vector<8xf32>
    %19 = vector.shape_cast %18 : vector<8xf32> to vector<8x1xf32>
    %20 = arith.subf %19, %11 : vector<8x1xf32>
    %c0_7 = arith.constant 0 : index
    %c0_8 = arith.constant 0 : index
    %21 = vector.load %arg5[%c0_7, %c0_8] : memref<1x1xf32, #tpu.memory_space<vmem>>, vector<1x1xf32>
    %22 = vector.shape_cast %20 : vector<8x1xf32> to vector<1x8x1xf32>
    %cst_9 = arith.constant dense<0.000000e+00> : vector<1xf32>
    %23 = vector.multi_reduction <add>, %22, %cst_9 [1, 2] : vector<1x8x1xf32> to vector<1xf32>
    %24 = vector.shape_cast %23 : vector<1xf32> to vector<1x1x1xf32>
    %25 = vector.extract %24[0, 0, 0] : f32 from vector<1x1x1xf32>
    %26 = vector.broadcast %25 : f32 to vector<1x1xf32>
    %27 = arith.addf %21, %26 : vector<1x1xf32>
    %c0_10 = arith.constant 0 : index
    %c0_11 = arith.constant 0 : index
    %28 = vector.load %arg5[%c0_10, %c0_11] : memref<1x1xf32, #tpu.memory_space<vmem>>, vector<1x1xf32>
    tpu.vector_store %arg5[%c0_10, %c0_11], %27 {strides = array<i32>} : memref<1x1xf32, #tpu.memory_space<vmem>>, vector<1x1xf32>,
    %c0_i32_12 = arith.constant 0 : i32
    %29 = arith.cmpi eq, %arg0, %c0_i32_12 : i32
    %30 = arith.extui %29 : i1 to i32
    %c0_i32_13 = arith.constant 0 : i32
    %31 = arith.cmpi ne, %30, %c0_i32_13 : i32
    scf.if %31 {
      %c0_14 = arith.constant 0 : index
      %c0_15 = arith.constant 0 : index
      %32 = vector.load %arg3[%c0_14, %c0_15] : memref<1x8xf32, #tpu.memory_space<vmem>>, vector<1x8xf32>
      %33 = vector.shape_cast %32 : vector<1x8xf32> to vector<1x1x8xf32>
      %cst_16 = arith.constant dense<0.000000e+00> : vector<1xf32>
      %34 = vector.multi_reduction <add>, %33, %cst_16 [1, 2] : vector<1x1x8xf32> to vector<1xf32>
      %35 = vector.shape_cast %34 : vector<1xf32> to vector<1x1x1xf32>
      %36 = vector.extract %35[0, 0, 0] : f32 from vector<1x1x1xf32>
      %37 = vector.broadcast %36 : f32 to vector<1x1xf32>
      %c0_17 = arith.constant 0 : index
      %c0_18 = arith.constant 0 : index
      %38 = vector.load %arg5[%c0_17, %c0_18] : memref<1x1xf32, #tpu.memory_space<vmem>>, vector<1x1xf32>
      %cst_19 = arith.constant 0.000000e+00 : f32
      %39 = vector.broadcast %cst_19 : f32 to vector<1x1xf32>
      %40 = arith.subf %39, %38 : vector<1x1xf32>
      %cst_20 = arith.constant 1.250000e-01 : f32
      %41 = vector.broadcast %cst_20 : f32 to vector<1x1xf32>
      %42 = arith.mulf %40, %41 : vector<1x1xf32>
      %43 = arith.mulf %42, %37 : vector<1x1xf32>
      %44 = arith.divf %43, %37 : vector<1x1xf32>
      %cst_21 = arith.constant 1.000000e+00 : f32
      %45 = vector.broadcast %cst_21 : f32 to vector<1x1xf32>
      %46 = arith.mulf %44, %45 : vector<1x1xf32>
      %c0_22 = arith.constant 0 : index
      %c0_23 = arith.constant 0 : index
      %47 = vector.load %arg4[%c0_22, %c0_23] : memref<1x1xf32, #tpu.memory_space<vmem>>, vector<1x1xf32>
      tpu.vector_store %arg4[%c0_22, %c0_23], %46 {strides = array<i32>} : memref<1x1xf32, #tpu.memory_space<vmem>>, vector<1x1xf32>,
    } else {
    }
    return
  }
  func.func @transform_0(%arg0: i32) -> (i32, i32) {
    %c0_i32 = arith.constant 0 : i32
    %c0_i32_0 = arith.constant 0 : i32
    return %arg0, %c0_i32 : i32, i32
  }
  func.func @transform_1(%arg0: i32) -> (i32, i32) {
    %c0_i32 = arith.constant 0 : i32
    %c0_i32_0 = arith.constant 0 : i32
    return %arg0, %c0_i32 : i32, i32
  }
  func.func @transform_2(%arg0: i32) -> (i32, i32) {
    %c0_i32 = arith.constant 0 : i32
    %c0_i32_0 = arith.constant 0 : i32
    %c0_i32_1 = arith.constant 0 : i32
    return %c0_i32, %c0_i32_0 : i32, i32
  }
  func.func @transform_3(%arg0: i32) -> (i32, i32) {
    %c0_i32 = arith.constant 0 : i32
    %c0_i32_0 = arith.constant 0 : i32
    %c0_i32_1 = arith.constant 0 : i32
    return %c0_i32, %c0_i32_0 : i32, i32
  }
}

</mosaic_0001>

<bundles_post_ra>
// kernel: tpu_custom_call.1
= control target key start
LH: loop header
LB: loop body
LE: loop exit
PB: predicated region body
PF: predicated region fallthrough
CT: control target
= control target key end

     0   :  { %vm22_vm0 = vcmask 261120   ;;  %s187_s0 = inlined_call_operand.vmem [shape: f32[8,32], index: 0, kind: input, shape index: {}]   ;;  %s188_s1 = inlined_call_operand.vmem [shape: s32[8,1], index: 1, kind: input, shape index: {}]   ;;  %s189_s2 = inlined_call_operand.vmem [shape: f32[1,8], index: 2, kind: input, shape index: {}]   ;;  %s190_s3 = inlined_call_operand.hbm [shape: f32[1,1], index: 3, kind: output, shape index: {}]  }
   0x1   :  { %v21_v0 = vld [vmem:[%s187_s0] sm:$0xff] }
   0x2   :  { %8 = vsyncpa [#allocation4], 0  ;;  %v23_v1 = vsel %vm22_vm0, %v21_v0, -inf  ;;  %v137_v2 = vmov 0   ;;  %v34_v3 = vld [vmem:[%s188_s1] sm:$0xff]  ;;  %v35_v7 = vlaneseq  ;;  %vm47_vm2 = vcmask 7168  }
   0x3   :  { %106 = vset.pattern.permute.xlu0 %v137_v2  ;;  %v65_v19 = vld [vmem:[%s189_s2] sm:$0x1]  ;;  %vm66_vm3 = vcmask 57344   ;;  %vm19_vm4 = vcmask 0   ;;  %v138_v22 = vmov 0.0   ;;  %s139_s17 = smov [#allocation3]  }
   0x4   :  { %24 = vmax.xlane.f32.xlu0 %v23_v1  ;;  %v36_v8 = vand.u32 127, %v35_v7  ;;  %v67_v21 = vsel %vm66_vm3, %v65_v19, 0.0  ;;  %20 = vst.msk [vmem:[#allocation2] sm:$0x1] %vm19_vm4, %v138_v22  ;;  %s91_s18 = sshll.u32 %s139_s17, 4  ;;  %s92_s18 = int_to_ptr.vmem [resolvable:$true] %s91_s18 }
   0x5   :  { %s113_s19 = scalar_lea.vmem %s92_s18, 16  ;;  %s117_s20 = scalar_lea.vmem %s92_s18, 32 }
   0x6   :  { %p114_p0 = scmp.ne.s32.totalorder %s92_s18, %s113_s19  ;;  %p118_p1 = scmp.lt.s32.totalorder %s92_s18, %s92_s18 }
   0x7   :  { %p119_p2 = scmp.lt.s32.totalorder %s117_s20, %s113_s19 }
   0x9   :  { %p120_p3 = por %p119_p2, %p118_p1 }
   0xb   :  { %v46_v37 = vld [vmem:[#allocation2] sm:$0x1]  ;;  %p121_p4 = pnand %p120_p3, %p114_p0 }
  0x1a   :  { %38 = vperm.xlu0 %106, %v34_v3  }
  0x91   :  { %v25_v4 = vpop.xlane.xlu0 %24 }
  0x92   :  { %v26_v5 = vsub.f32 %v21_v0, %v25_v4 }
  0x94   :  { %v27_v6 = vmul.f32 1.442695, %v26_v5 }
  0x96   :  { %107 = vpow2.f32 %v27_v6 }
  0x99   :  { %v39_v9 = vpop.permute.xlu0 %38 }
  0x9a   :  { %vm40_vm1 = vcmp.eq.s32.totalorder %v36_v8, %v39_v9 }
  0x9b   :  { %v41_v12 = vsel %vm40_vm1, %v26_v5, 0.0 }
  0x9c   :  { %v42_v13 = vsel %vm22_vm0, %v41_v12, 0.0 }
  0xa0   :  { %v108_v10 = vpop.eup %107 }
  0xa1   :  { %v29_v11 = vsel %vm22_vm0, %v108_v10, 0.0 }
  0xa2   :  { %30 = vadd.xlane.f32.xlu1 %v29_v11 }
  0xa6   :  { %43 = vadd.xlane.f32.xlu1 %v42_v13 }
 0x12f   :  { %v31_v14 = vpop.xlane.xlu1 %30 }
 0x130   :  { %109 = vlog2.f32 %v31_v14 }
 0x133   :  { %v44_v17 = vpop.xlane.xlu1 %43 }
 0x13a   :  { %v110_v15 = vpop.eup %109 }
 0x13b   :  { %v33_v16 = vmul.f32 0.6931472, %v110_v15 }
 0x13d   :  { %v45_v18 = vsub.f32 %v44_v17, %v33_v16 }
 0x13f   :  { %v48_v20 = vsel %vm47_vm2, %v45_v18, 0.0 }
 0x140   :  { %49 = vadd.xlane.f32.xlu1 %v48_v20 }
 0x144   :  { %68 = vadd.xlane.f32.xlu1 %v67_v21 }
 0x1cd   :  { %v50_v23 = vpop.xlane.xlu1 %49 }
 0x1ce   :  { %v51_v24 = vrot.slane %v50_v23, 4 }
 0x1d0   :  { %v52_v25 = vadd.f32 %v51_v24, %v50_v23 }
 0x1d1   :  { %v69_v26 = vpop.xlane.xlu1 %68 }
 0x1d2   :  { %v53_v27 = vrot.slane %v52_v25, 2  ;;  %v70_v28 = vrot.slane %v69_v26, 4 }
 0x1d4   :  { %v71_v29 = vadd.f32 %v70_v28, %v69_v26  ;;  %v54_v30 = vadd.f32 %v53_v27, %v52_v25 }
 0x1d6   :  { %v72_v31 = vrot.slane %v71_v29, 2  ;;  %v55_v32 = vrot.slane %v54_v30, 1 }
 0x1d8   :  { %v73_v33 = vadd.f32 %v72_v31, %v71_v29  ;;  %v56_v34 = vadd.f32 %v55_v32, %v54_v30 }
 0x1da   :  { %99 = vpush %v56_v34  ;;  %v74_v35 = vrot.slane %v73_v33, 1 }
 0x1dc   :  { %v75_v36 = vadd.f32 %v74_v35, %v73_v33 }
 0x1de   :  { %101 = vpush %v75_v36 }
 0x20b   :  { %s100_s2 = spop %99 }
 0x20c   :  { %v58_v38 = vstv %s100_s2 }
 0x20d   :  { %v59_v39 = vadd.f32 %v58_v38, %v46_v37 }
 0x20f   :  { %61 = vst.msk [vmem:[#allocation2] sm:$0x1] %vm19_vm4, %v59_v39  ;;  %s102_s16 = spop %101 }
 0x210   :  { %v77_v40 = vstv %s102_s16 }
 0x211   :  { %111 = vrcp.f32 %v77_v40 }
 0x216   :  { %v78_v41 = vld [vmem:[#allocation2] sm:$0x1] }
 0x217   :  { %v79_v42 = vsub.f32 0.0, %v78_v41 }
 0x219   :  { %v80_v43 = vmul.f32 0.125, %v79_v42 }
 0x21b   :  { %v112_v44 = vpop.eup %111  ;;  %v81_v45 = vmul.f32 %v80_v43, %v77_v40 }
 0x21d   :  { %v83_v46 = vmul.f32 %v112_v44, %v81_v45 }
 0x21f   :  { %84 = vst.msk [vmem:[#allocation3] sm:$0x1] %vm19_vm4, %v83_v46 }
 0x220   :  { %124 = shalt.err (!%p121_p4)
}
 0x221   :  { %s125_s23 = scalar_lea.hbm %s190_s3, 16 }
 0x222   :  { %p126_p5 = scmp.ne.s32.totalorder %s190_s3, %s125_s23  ;;  %p129_p6 = scmp.lt.u32.totalorder %s125_s23, %s190_s3 }
 0x224   :  { %p131_p7 = pnand %p129_p6, %p126_p5 }
 0x226   :  { %134 = shalt.err (!%p131_p7)
}
 0x227   :  { %94 = dma.vmem_to_hbm [thread:$0]  %s92_s18, 16, %s190_s3, [#allocation4]  }
 0x228   :  { %135 = dma.done.wait [#allocation4], 16  }
 0x229   :  { %136 = vsyncadd [#allocation4], 4294967280 }
 0x22a   :  { %98 = vsyncpa [#allocation4], 1 }

</bundles_post_ra>
